<compile_context>
chip_gen: v6e
topology: v6e:2x2x1
jax: 0.10.0
libtpu: 0.0.40
codegen_flags: <defaults>
</compile_context>

<pallas_src>
import functools

import jax
import jax.numpy as jnp
from jax.experimental import pallas as pl
from jax.experimental.pallas import tpu as pltpu


def _round_up(x, m):
    return ((x + m - 1) // m) * m


# -----------------------------------------------------------------------------
# Fused kernel: one grid step per encoder branch (0 = text, 1 = image).
# Each branch is a single full-block matmul + bias add on the MXU -- no K
# tiling, no accumulator init/finalize branches (shapes fit trivially in VMEM).
# -----------------------------------------------------------------------------
def _fused_encoder_kernel(x_ref, w_ref, b_ref, o_ref):
    o_ref[...] = (
        jnp.dot(x_ref[...], w_ref[...], preferred_element_type=jnp.float32)
        + b_ref[...]
    )


def fused_clip_encoders(x_stacked, w_stacked, b_stacked):
    """x:[2,M,K] bf16, w:[2,K,N] bf16, b:[2,1,N] f32 -> out:[2,M,N] f32."""
    nb, m_pad, k_pad = x_stacked.shape
    nb2, k2, n_pad = w_stacked.shape
    assert nb == nb2 == 2 and k2 == k_pad
    assert b_stacked.shape == (nb, 1, n_pad)
    assert m_pad % 8 == 0 and k_pad % 128 == 0 and n_pad % 128 == 0

    # Single-block-per-branch path: everything (double-buffered) must fit in
    # VMEM.  ~0.6 MiB at the model's shapes; 12 MiB keeps us below every
    # generation's default scoped VMEM limit (v5e 16 MiB, v6e/v7x 32 MiB).
    bytes_per_branch = (
        m_pad * k_pad * x_stacked.dtype.itemsize          # activations
        + k_pad * n_pad * w_stacked.dtype.itemsize        # weights
        + n_pad * 4                                       # bias (f32)
        + m_pad * n_pad * 4                               # f32 output block
    )
    assert 2 * bytes_per_branch <= 12 * 1024 * 1024, (
        "fused single-block path would overflow VMEM; a K/N-tiled fallback is "
        "needed for these shapes")
    # TODO(synk): add a K-tiled accumulator path if the encoders ever grow
    # beyond a few MiB of weights per branch.

    return pl.pallas_call(
        _fused_encoder_kernel,
        out_shape=jax.ShapeDtypeStruct((nb, m_pad, n_pad), jnp.float32),
        grid_spec=pltpu.PrefetchScalarGridSpec(
            num_scalar_prefetch=0,
            grid=(nb,),                                   # branch axis: text / image
            in_specs=[
                pl.BlockSpec((None, m_pad, k_pad), lambda i: (i, 0, 0)),
                pl.BlockSpec((None, k_pad, n_pad), lambda i: (i, 0, 0)),
                pl.BlockSpec((None, 1, n_pad), lambda i: (i, 0, 0)),
            ],
            out_specs=pl.BlockSpec((None, m_pad, n_pad), lambda i: (i, 0, 0)),
        ),
        compiler_params=pltpu.CompilerParams(
            # v7x: each TensorCore runs one encoder branch; no-op on v5e/v6e.
            dimension_semantics=("parallel",)),
    )(x_stacked, w_stacked, b_stacked)


# -----------------------------------------------------------------------------
# One-time parameter packing: bf16, lane-padded, stacked [text, image].
# -----------------------------------------------------------------------------
def pack_clip_params(params, *, compute_dtype=jnp.bfloat16):
    w_txt, b_txt = params["w_txt"], params["b_txt"]
    w_img, b_img = params["w_img"], params["b_img"]
    k_txt, e = w_txt.shape
    k_img, e2 = w_img.shape
    assert e == e2 and b_txt.shape == (e,) and b_img.shape == (e,)

    k_pad = _round_up(max(k_txt, k_img, 128), 128)        # shared, lane-aligned K
    n_pad = _round_up(e, 128)                             # lane-aligned N

    def pad_w(w):
        return jnp.pad(
            w, ((0, k_pad - w.shape[0]), (0, n_pad - e))).astype(compute_dtype)

    def pad_b(b):
        return jnp.pad(b, (0, n_pad - e)).astype(jnp.float32)

    return {
        "w": jnp.stack([pad_w(w_txt), pad_w(w_img)]),               # [2,K,N] bf16
        "b": jnp.stack([pad_b(b_txt), pad_b(b_img)]).reshape(2, 1, n_pad),
    }


# -----------------------------------------------------------------------------
# Forward pass (mirrors CLIPModel.forward)
# -----------------------------------------------------------------------------
@functools.partial(jax.jit, static_argnames="embed_dim")
def clip_model_forward(texts, images, packed, *, embed_dim):
    """texts:[B,S,D], images:[B,C,H,W] -> (text_feat [B,E], image_feat [B,E])."""
    b = texts.shape[0]
    # text_encoder: mean-pool hoisted in front of the affine
    # (mean(xW + bias) == mean(x)W + bias for a purely affine encoder).
    x_txt = texts.mean(axis=1)                            # [B, D_txt]
    # image_encoder: flatten NCHW row-major -> Linear
    x_img = images.reshape(b, -1)                         # [B, C*H*W]

    k_pad = packed["w"].shape[1]
    m_pad = _round_up(max(b, 8), 8)                       # full sublane usage
    cdt = packed["w"].dtype

    def prep(x):                                          # zero-pad + one bf16 cast
        return jnp.pad(
            x, ((0, m_pad - b), (0, k_pad - x.shape[1]))).astype(cdt)

    x_stacked = jnp.stack([prep(x_txt), prep(x_img)])     # [2, M_pad, K_pad] bf16

    out = fused_clip_encoders(x_stacked, packed["w"], packed["b"])

    text_feat = out[0, :b, :embed_dim]
    image_feat = out[1, :b, :embed_dim]
    text_feat = text_feat                                 # self.fc = nn.Identity()
    return text_feat, image_feat


def init_params(key, *, d_text, c, h, w, embed_dim):
    k1, k2, k3, k4 = jax.random.split(key, 4)
    return {
        "w_txt": jax.random.normal(k1, (d_text, embed_dim), jnp.float32) * 0.02,
        "b_txt": jax.random.normal(k2, (embed_dim,), jnp.float32) * 0.02,
        "w_img": jax.random.normal(k3, (c * h * w, embed_dim), jnp.float32) * 0.02,
        "b_img": jax.random.normal(k4, (embed_dim,), jnp.float32) * 0.02,
    }


if __name__ == "__main__":
    # Small deterministic shapes consistent with the forward:
    #   texts : [B, S, D]    = [2, 8, 32]
    #   images: [B, C, H, W] = [2, 4, 16, 16]   (NCHW)
    #   embed dim E          = 128
    B, S, D = 2, 8, 32
    C, H, W = 4, 16, 16
    E = 128

    key = jax.random.PRNGKey(0)
    k_t, k_i, k_p = jax.random.split(key, 3)
    texts = jax.random.normal(k_t, (B, S, D), jnp.float32)
    images = jax.random.normal(k_i, (B, C, H, W), jnp.float32)
    params = init_params(k_p, d_text=D, c=C, h=H, w=W, embed_dim=E)

    packed = jax.block_until_ready(pack_clip_params(params))   # one-time pack

    text_feat, image_feat = clip_model_forward(texts, images, packed, embed_dim=E)
    jax.block_until_ready((text_feat, image_feat))
    assert text_feat.shape == (B, E) and image_feat.shape == (B, E)

    # Reference 1: same bf16 compute dtype / f32 accumulation (tight check).
    def ref_linear_bf16(x, w, b):
        return jnp.dot(x.astype(jnp.bfloat16), w.astype(jnp.bfloat16),
                       preferred_element_type=jnp.float32) + b

    ref_text = ref_linear_bf16(texts.mean(axis=1),
                               params["w_txt"], params["b_txt"])
    ref_img = ref_linear_bf16(images.reshape(B, -1),
                              params["w_img"], params["b_img"])
    assert jnp.allclose(text_feat, ref_text, atol=1e-2, rtol=1e-2)
    assert jnp.allclose(image_feat, ref_img, atol=1e-2, rtol=1e-2)

    # Reference 2: f32, original module semantics (mean-pool AFTER the affine)
    # -> verifies the algebraic hoist preserves the forward, modulo bf16 noise.
    ref_text_f32 = (texts.reshape(B * S, D) @ params["w_txt"]
                    + params["b_txt"]).reshape(B, S, E).mean(axis=1)
    ref_img_f32 = images.reshape(B, -1) @ params["w_img"] + params["b_img"]
    assert jnp.allclose(text_feat, ref_text_f32, atol=5e-2, rtol=5e-2)
    assert jnp.allclose(image_feat, ref_img_f32, atol=5e-2, rtol=5e-2)

    print("KERNEL_OK")
</pallas_src>

<mosaic_0001>
module attributes {stable_mosaic.version = 11 : i64} {
  func.func @_fused_encoder_kernel(%arg0: i32, %arg1: memref<1x8x1024xbf16, #tpu.memory_space<vmem>>, %arg2: memref<1x1024x128xbf16, #tpu.memory_space<vmem>>, %arg3: memref<1x1x128xf32, #tpu.memory_space<vmem>>, %arg4: memref<1x8x128xf32, #tpu.memory_space<vmem>>) attributes {dimension_semantics = [#tpu.dimension_semantics<parallel>], iteration_bounds = array<i64: 2>, scalar_prefetch = 0 : i64, scratch_operands = 0 : i64, tpu.core_type = #tpu.core_type<tc>, window_params = [{transform_indices = @transform_0, window_bounds = array<i64: 1, 8, 1024>}, {transform_indices = @transform_1, window_bounds = array<i64: 1, 1024, 128>}, {transform_indices = @transform_2, window_bounds = array<i64: 1, 1, 128>}, {transform_indices = @transform_3, window_bounds = array<i64: 1, 8, 128>}]} {
    %c0 = arith.constant 0 : index
    %c0_0 = arith.constant 0 : index
    %c0_1 = arith.constant 0 : index
    %0 = vector.load %arg1[%c0, %c0_0, %c0_1] : memref<1x8x1024xbf16, #tpu.memory_space<vmem>>, vector<1x8x1024xbf16>
    %1 = vector.shape_cast %0 : vector<1x8x1024xbf16> to vector<8x1024xbf16>
    %c0_2 = arith.constant 0 : index
    %c0_3 = arith.constant 0 : index
    %c0_4 = arith.constant 0 : index
    %2 = vector.load %arg2[%c0_2, %c0_3, %c0_4] : memref<1x1024x128xbf16, #tpu.memory_space<vmem>>, vector<1x1024x128xbf16>
    %3 = vector.shape_cast %2 : vector<1x1024x128xbf16> to vector<1024x128xbf16>
    %cst = arith.constant dense<0.000000e+00> : vector<8x128xf32>
    %4 = tpu.matmul %1, %3, %cst {dimension_numbers = #tpu.dot_dimension_numbers<[1], [0], [0], [1], [0, 0, 1, 1], [], []>} : vector<8x1024xbf16>, vector<1024x128xbf16>, vector<8x128xf32> -> vector<8x128xf32>
    %c0_5 = arith.constant 0 : index
    %c0_6 = arith.constant 0 : index
    %c0_7 = arith.constant 0 : index
    %5 = vector.load %arg3[%c0_5, %c0_6, %c0_7] : memref<1x1x128xf32, #tpu.memory_space<vmem>>, vector<1x1x128xf32>
    %6 = vector.shape_cast %5 : vector<1x1x128xf32> to vector<1x128xf32>
    %7 = vector.broadcast %6 : vector<1x128xf32> to vector<8x128xf32>
    %8 = arith.addf %4, %7 : vector<8x128xf32>
    %c0_8 = arith.constant 0 : index
    %c0_9 = arith.constant 0 : index
    %c0_10 = arith.constant 0 : index
    %9 = vector.load %arg4[%c0_8, %c0_9, %c0_10] : memref<1x8x128xf32, #tpu.memory_space<vmem>>, vector<1x8x128xf32>
    %10 = vector.shape_cast %9 : vector<1x8x128xf32> to vector<8x128xf32>
    %11 = vector.shape_cast %8 : vector<8x128xf32> to vector<1x8x128xf32>
    tpu.vector_store %arg4[%c0_8, %c0_9, %c0_10], %11 {strides = array<i32>} : memref<1x8x128xf32, #tpu.memory_space<vmem>>, vector<1x8x128xf32>,
    return
  }
  func.func @transform_0(%arg0: i32) -> (i32, i32, i32) {
    %c0_i32 = arith.constant 0 : i32
    %c0_i32_0 = arith.constant 0 : i32
    %c0_i32_1 = arith.constant 0 : i32
    return %arg0, %c0_i32, %c0_i32_0 : i32, i32, i32
  }
  func.func @transform_1(%arg0: i32) -> (i32, i32, i32) {
    %c0_i32 = arith.constant 0 : i32
    %c0_i32_0 = arith.constant 0 : i32
    %c0_i32_1 = arith.constant 0 : i32
    return %arg0, %c0_i32, %c0_i32_0 : i32, i32, i32
  }
  func.func @transform_2(%arg0: i32) -> (i32, i32, i32) {
    %c0_i32 = arith.constant 0 : i32
    %c0_i32_0 = arith.constant 0 : i32
    %c0_i32_1 = arith.constant 0 : i32
    return %arg0, %c0_i32, %c0_i32_0 : i32, i32, i32
  }
  func.func @transform_3(%arg0: i32) -> (i32, i32, i32) {
    %c0_i32 = arith.constant 0 : i32
    %c0_i32_0 = arith.constant 0 : i32
    %c0_i32_1 = arith.constant 0 : i32
    return %arg0, %c0_i32, %c0_i32_0 : i32, i32, i32
  }
}

</mosaic_0001>

<bundles_post_ra>
// kernel: clip_model_forward.1
= control target key start
LH: loop header
LB: loop body
LE: loop exit
PB: predicated region body
PF: predicated region fallthrough
CT: control target
= control target key end

     0   :  { %8 = vsyncpa [#allocation3], 0  ;;  %s1582_s0 = inlined_call_operand.vmem [shape: bf16[2,8,1024], index: 0, kind: input, shape index: {}]   ;;  %s1583_s1 = inlined_call_operand.hbm [shape: bf16[2,1024,128], index: 1, kind: input, shape index: {}]   ;;  %s1584_s2 = inlined_call_operand.vmem [shape: f32[2,1,128], index: 2, kind: input, shape index: {}]   ;;  %s1585_s3 = inlined_call_operand.vmem [shape: f32[2,8,128], index: 3, kind: output, shape index: {}]  }
   0x1   :  { %10 = vsyncpa [#allocation3 + $0x1], 0  ;;  %s1398_s12 = smov 0   ;;  %s1400_s13 = smov 0  }
   0x2   :  { %s1402_s14 = smov 0   ;;  %s1404_s15 = smov 0  }
   0x3 LB: > { %s1417_s16 = sadd.s32 4294967295, %s1373_s15   ;;  %s1420_s17 = sadd.s32 1, %s1373_s15   ;;  %s1373_s15 = sphi %s1404_s15, %s1594_s15   ;;  %s1369_s14 = sphi %s1402_s14, %s1593_s14   ;;  %s1365_s13 = sphi %s1400_s13, %s1592_s13   ;;  %s1361_s12 = sphi %s1398_s12, %s1591_s12  }
   0x4   : > { %s46_s18 = ssub.s32 %s1373_s15, %s1420_s17  ;;  %s49_s19 = sadd.s32 1, %s1369_s14 }
   0x5   : > { %p47_p0 = scmp.eq.s32.totalorder %s46_s18, 0  ;;  %p56_p1 = scmp.ne.s32.totalorder %s1369_s14, %s1365_s13 }
   0x6   : > { %p57_p2 = scmp.eq.s32.totalorder %s1373_s15, 0  ;;  %p62_p3 = scmp.ne.s32.totalorder %s1365_s13, %s1361_s12 }
   0x7   : > { %s1430_s20 = scalar_select %p47_p0, %s1369_s14, %s49_s19  }
   0x8   : > { %p58_p4 = por %p57_p2, %p56_p1  ;;  %p63_p5 = scmp.eq.s32.totalorder %s1417_s16, 0 }
   0x9   : > { %p1204_p6 = scmp.lt.s32.totalorder %s1373_s15, 2  ;;  %s146_s22 = sand.u32 1, %s1369_s14  }
   0xa   : > { %p1434_p7 = por %p63_p5, %p62_p3  ;;  %s1025_s23 = sshll.u32 %s146_s22, 9 }
   0xb   : > { %s1108_s24 = sshll.u32 %s1373_s15, 13  ;;  %s150_s28 = scalar_lea.vmem [#allocation2], %s1025_s23 }
   0xc   : > { %s1587_s21 = scalar_select %p1434_p7, 1, 0 }
   0xd   : > { %s1443_s27 = scalar_lea.hbm %s1583_s1, %s1108_s24  ;;  %s157_s29 = sshll.u32 %s150_s28, 4  ;;  %s1445_s29 = int_to_ptr.vmem [resolvable:$true] %s157_s29 }
   0xe   : > { %p1447_p8 = pnand %p1204_p6, %p58_p4  ;;  %s1452_s4 = scalar_lea.sflag [#allocation3], %s146_s22 }
   0xf   : > { %s1311_s5 = scalar_lea.hbm %s1443_s27, 8192  ;;  %s1316_s8 = scalar_lea.hbm %s1583_s1, 16384 }
  0x10   : > { %p1312_p10 = scmp.ne.s32.totalorder %s1443_s27, %s1311_s5  ;;  %p1313_p11 = pneg %p1447_p8 }
  0x11   : > { %p1317_p0 = scmp.lt.s32.totalorder %s1443_s27, %s1583_s1  ;;  %p1318_p1 = scmp.lt.s32.totalorder %s1316_s8, %s1311_s5 }
  0x12   : > { %p1314_p12 = pnand %p1313_p11, %p1312_p10 }
  0x13   : > { %p1319_p2 = por %p1318_p1, %p1317_p0 }
  0x14   : > { %p1315_p13 = pneg %p1314_p12 }
  0x16   : > { %p1320_p3 = pnand %p1319_p2, %p1315_p13 }
  0x18   : > { %1323 = shalt.err (!%p1320_p3)
}
  0x19   : > { %s1324_s11 = scalar_lea.vmem %s1445_s29, 8192  ;;  %s1375_s12 = smov [#allocation2]  }
  0x1a   : > { %p1325_p4 = scmp.ne.s32.totalorder %s1445_s29, %s1324_s11  ;;  %s1329_s18 = sshll.u32 %s1375_s12, 4  ;;  %s1330_s18 = int_to_ptr.vmem [resolvable:$false] %s1329_s18 }
  0x1b   : > { %s1331_s19 = scalar_lea.vmem %s1330_s18, 16384  ;;  %p1332_p10 = scmp.lt.s32.totalorder %s1445_s29, %s1330_s18 }
  0x1c   : > { %p1327_p5 = pnand %p1325_p4, %p1313_p11  ;;  %p1333_p12 = scmp.lt.s32.totalorder %s1331_s19, %s1324_s11 }
  0x1e   : > { %p1328_p6 = pneg %p1327_p5  ;;  %p1334_p9 = por %p1333_p12, %p1332_p10 }
  0x20   : > { %p1335_p7 = pnand %p1334_p9, %p1328_p6 }
  0x22   : > { %1338 = shalt.err (!%p1335_p7)
}
  0x23   : > { %s1376_s22 = smov 64   ;;  %s1377_s23 = smov 4  }
  0x24   : > { %1203 = dma.hbm_to_vmem [thread:$0]  (!%p1447_p8), %s1443_s27, 8192, %s1445_s29, %s1452_s4, %s1376_s22, %s1376_s22, %s1377_s23  }
  0x25   : > { %p171_p11 = scmp.lt.s32.totalorder %s1373_s15, 3  ;;  %p1589_p13 = scmp.ge.s32.totalorder %s1373_s15, 1 }
  0x27   : > { %p172_p0 = pnand %p1589_p13, %p171_p11 }
  0x28   : > { %s177_s24 = sand.u32 (!%p172_p0), 1, %s1365_s13   ;;  %p1590_p7 = scmp.ne.s32.totalorder (!%p172_p0), %s1587_s21, 0 }
  0x29   : > { %175 = sbr.rel (%p172_p0) target bundleno = 315 (0x13b), region = 32  ;;  %s1029_s25 = sshll.u32 (!%p172_p0), %s177_s24, 9 }
  0x2a   : > { %s178_s26 = scalar_lea.sflag (!%p172_p0), [#allocation3], %s177_s24  ;;  %s1477_s28 = scalar_lea.vmem (!%p172_p0), [#allocation2], %s1029_s25 }
  0x2e   : > { %1356 = dma.done.wait (%p1590_p7), %s178_s26, 8192  }
  0x2f   : > { %1358 = vsyncadd (%p1590_p7), %s178_s26, 4294959104  ;;  %v1239_v0 = vld [vmem:[%s1477_s28 + $0x78] sm:$0xff]   ;;  %v1243_v4 = vld [vmem:[%s1477_s28 + $0x70] sm:$0xff]   ;;  %p211_p8 = scmp.lt.s32.totalorder %s1417_s16, 1 }
  0x30   : > { %v1240_v1 = vld [vmem:[%s1477_s28 + $0xf8] sm:$0xff]   ;;  %1110 = vmatprep.subr.bf16.mxu0 %v1239_v0  ;;  %v1244_v5 = vld [vmem:[%s1477_s28 + $0xf0] sm:$0xff]   ;;  %v1247_v8 = vld [vmem:[%s1477_s28 + $0x68] sm:$0xff]  }
  0x31   : > { %v1241_v2 = vld [vmem:[%s1477_s28 + $0x38] sm:$0xff]   ;;  %1132 = vmatprep.subr.bf16.mxu1 %v1240_v1  ;;  %v1245_v6 = vld [vmem:[%s1477_s28 + $0x30] sm:$0xff]   ;;  %v1248_v9 = vld [vmem:[%s1477_s28 + $0xe8] sm:$0xff]   ;;  %s1596_s16 = smov (!%p211_p8, %s1417_s16), 1 }
  0x32   : > { %v1242_v3 = vld [vmem:[%s1477_s28 + $0xb8] sm:$0xff]   ;;  %1111 = vmatpush3.bf16.msra.mxu0 %v1241_v2  ;;  %v1246_v7 = vld [vmem:[%s1477_s28 + $0xb0] sm:$0xff]   ;;  %v1249_v10 = vld [vmem:[%s1477_s28 + $0x28] sm:$0xff]   ;;  %s1109_s15 = sshll.u32 %s1596_s16, 5  ;;  %s218_s5 = scalar_lea.vmem %s1584_s2, %s1596_s16 }
  0x33   : > { %1133 = vmatpush3.bf16.msra.mxu1 %v1242_v3  ;;  %1112 = vmatprep.subr.bf16.mxu0 %v1243_v4  ;;  %v1250_v11 = vld [vmem:[%s1477_s28 + $0xa8] sm:$0xff]   ;;  %v1251_v12 = vld [vmem:[%s1477_s28 + $0x60] sm:$0xff]   ;;  %v1255_v16 = vld [vmem:[%s1477_s28 + $0x58] sm:$0xff]   ;;  %s1521_s29 = scalar_lea.vmem %s1582_s0, %s1109_s15  ;;  %s1032_s6 = sshll.u32 %s1596_s16, 3 }
  0x34   : > { %1134 = vmatprep.subr.bf16.mxu1 %v1244_v5  ;;  %v1252_v13 = vld [vmem:[%s1477_s28 + $0xe0] sm:$0xff]   ;;  %v1256_v17 = vld [vmem:[%s1477_s28 + $0xd8] sm:$0xff]   ;;  %v1259_v20 = vld [vmem:[%s1477_s28 + $0x50] sm:$0xff]   ;;  %s222_s9 = scalar_lea.vmem %s1585_s3, %s1032_s6 }
  0x35   : > { %v1253_v14 = vld [vmem:[%s1477_s28 + $0x20] sm:$0xff]   ;;  %v1257_v18 = vld [vmem:[%s1477_s28 + $0x18] sm:$0xff]   ;;  %v1260_v21 = vld [vmem:[%s1477_s28 + $0xd0] sm:$0xff]  }
  0x36   : > { %1113 = vmatpush3.bf16.msra.mxu0 %v1245_v6  ;;  %v1254_v15 = vld [vmem:[%s1477_s28 + $0xa0] sm:$0xff]   ;;  %v1258_v19 = vld [vmem:[%s1477_s28 + $0x98] sm:$0xff]   ;;  %v1261_v22 = vld [vmem:[%s1477_s28 + $0x10] sm:$0xff]  }
  0x37   : > { %1135 = vmatpush3.bf16.msra.mxu1 %v1246_v7  ;;  %1114 = vmatprep.subr.bf16.mxu0 %v1247_v8  ;;  %v1262_v23 = vld [vmem:[%s1477_s28 + $0x90] sm:$0xff]   ;;  %v1263_v24 = vld [vmem:[%s1477_s28 + $0x48] sm:$0xff]   ;;  %v1267_v28 = vld [vmem:[%s1477_s28 + $0x40] sm:$0xff]  }
  0x38   : > { %1136 = vmatprep.subr.bf16.mxu1 %v1248_v9  ;;  %v1264_v25 = vld [vmem:[%s1477_s28 + $0xc8] sm:$0xff]   ;;  %v1268_v29 = vld [vmem:[%s1477_s28 + $0xc0] sm:$0xff]   ;;  %v1275_v38 = vld [vmem:[%s1477_s28 + $0x178] sm:$0xff]  }
  0x39   : > { %v1265_v26 = vld [vmem:[%s1477_s28 + $0x8] sm:$0xff]   ;;  %v1269_v30 = vld [vmem:[%s1477_s28] sm:$0xff]   ;;  %v1276_v39 = vld [vmem:[%s1477_s28 + $0x1f8] sm:$0xff]  }
  0x3a   : > { %1115 = vmatpush3.bf16.msra.mxu0 %v1249_v10  ;;  %v1266_v27 = vld [vmem:[%s1477_s28 + $0x88] sm:$0xff]   ;;  %v1270_v31 = vld [vmem:[%s1477_s28 + $0x80] sm:$0xff]   ;;  %v1277_v40 = vld [vmem:[%s1477_s28 + $0x138] sm:$0xff]  }
  0x3b   : > { %1137 = vmatpush3.bf16.msra.mxu1 %v1250_v11  ;;  %1116 = vmatprep.subr.bf16.mxu0 %v1251_v12  ;;  %v224_v32 = vld [vmem:[%s1521_s29] sm:$0xff]  ;;  %v225_v33 = vld [vmem:[%s1521_s29 + $0x8] sm:$0xff]  ;;  %v1278_v41 = vld [vmem:[%s1477_s28 + $0x1b8] sm:$0xff]  }
  0x3c   : > { %1138 = vmatprep.subr.bf16.mxu1 %v1252_v13  ;;  %v1034_v34 = vcombine.low %v224_v32, %v224_v32  ;;  %v1035_v35 = vcombine.high %v224_v32, %v224_v32  ;;  %v1036_v36 = vcombine.low %v225_v33, %v225_v33  ;;  %v1037_v37 = vcombine.high %v225_v33, %v225_v33  ;;  %v1279_v42 = vld [vmem:[%s1477_s28 + $0x170] sm:$0xff]   ;;  %v1283_v46 = vld [vmem:[%s1477_s28 + $0x168] sm:$0xff]   ;;  %v1287_v50 = vld [vmem:[%s1477_s28 + $0x160] sm:$0xff]  }
  0x3d   : > { %v1280_v43 = vld [vmem:[%s1477_s28 + $0x1f0] sm:$0xff]   ;;  %v1284_v47 = vld [vmem:[%s1477_s28 + $0x1e8] sm:$0xff]   ;;  %v1288_v51 = vld [vmem:[%s1477_s28 + $0x1e0] sm:$0xff]  }
  0x3e   : > { %1117 = vmatpush3.bf16.msra.mxu0 %v1253_v14  ;;  %807 = vmatprep.mubr.bf16.mxu0 %v1035_v35  ;;  %v1281_v44 = vld [vmem:[%s1477_s28 + $0x130] sm:$0xff]   ;;  %v1285_v48 = vld [vmem:[%s1477_s28 + $0x128] sm:$0xff]   ;;  %v1289_v52 = vld [vmem:[%s1477_s28 + $0x120] sm:$0xff]  }
  0x3f   : > { %1139 = vmatpush3.bf16.msra.mxu1 %v1254_v15  ;;  %1118 = vmatprep.subr.bf16.mxu0 %v1255_v16  ;;  %v1282_v45 = vld [vmem:[%s1477_s28 + $0x1b0] sm:$0xff]   ;;  %v1286_v49 = vld [vmem:[%s1477_s28 + $0x1a8] sm:$0xff]   ;;  %v1290_v53 = vld [vmem:[%s1477_s28 + $0x1a0] sm:$0xff]  }
  0x40   : > { %1140 = vmatprep.subr.bf16.mxu1 %v1256_v17  ;;  %847 = vmatprep.mubr.bf16.mxu1 %v1037_v37  ;;  %v1291_v54 = vld [vmem:[%s1477_s28 + $0x158] sm:$0xff]   ;;  %v1295_v58 = vld [vmem:[%s1477_s28 + $0x150] sm:$0xff]   ;;  %v1299_v62 = vld [vmem:[%s1477_s28 + $0x148] sm:$0xff]  }
  0x41   : > { %v1292_v55 = vld [vmem:[%s1477_s28 + $0x1d8] sm:$0xff]   ;;  %v1296_v59 = vld [vmem:[%s1477_s28 + $0x1d0] sm:$0xff]   ;;  %v1300_v63 = vld [vmem:[%s1477_s28 + $0x1c8] sm:$0xff]  }
  0x42   : > { %1119 = vmatpush3.bf16.msra.mxu0 %v1257_v18  ;;  %v1293_v56 = vld [vmem:[%s1477_s28 + $0x118] sm:$0xff]   ;;  %v1297_v60 = vld [vmem:[%s1477_s28 + $0x110] sm:$0xff]   ;;  %v1301_v0 = vld [vmem:[%s1477_s28 + $0x108] sm:$0xff]  }
  0x43   : > { %1141 = vmatpush3.bf16.msra.mxu1 %v1258_v19  ;;  %1120 = vmatprep.subr.bf16.mxu0 %v1259_v20  ;;  %v1294_v57 = vld [vmem:[%s1477_s28 + $0x198] sm:$0xff]   ;;  %v1298_v61 = vld [vmem:[%s1477_s28 + $0x190] sm:$0xff]   ;;  %v1302_v1 = vld [vmem:[%s1477_s28 + $0x188] sm:$0xff]  }
  0x44   : > { %1142 = vmatprep.subr.bf16.mxu1 %v1260_v21  ;;  %v1303_v2 = vld [vmem:[%s1477_s28 + $0x140] sm:$0xff]   ;;  %v226_v6 = vld [vmem:[%s1521_s29 + $0x10] sm:$0xff]  ;;  %v227_v9 = vld [vmem:[%s1521_s29 + $0x18] sm:$0xff] }
  0x45   : > { %v1304_v3 = vld [vmem:[%s1477_s28 + $0x1c0] sm:$0xff]   ;;  %v1038_v7 = vcombine.low %v226_v6, %v226_v6  ;;  %v1039_v8 = vcombine.high %v226_v6, %v226_v6  ;;  %v1040_v10 = vcombine.low %v227_v9, %v227_v9  ;;  %v1041_v11 = vcombine.high %v227_v9, %v227_v9 }
  0x46   : > { %1121 = vmatpush3.bf16.msra.mxu0 %v1261_v22  ;;  %v1305_v4 = vld [vmem:[%s1477_s28 + $0x100] sm:$0xff]  }
  0x47   : > { %1143 = vmatpush3.bf16.msra.mxu1 %v1262_v23  ;;  %1122 = vmatprep.subr.bf16.mxu0 %v1263_v24  ;;  %v1306_v5 = vld [vmem:[%s1477_s28 + $0x180] sm:$0xff]  }
  0x48   : > { %1144 = vmatprep.subr.bf16.mxu1 %v1264_v25  ;;  %v1033_v21 = vld [vmem:[%s218_s5] ss:$0 sm:$0xff] }
  0x4a   : > { %1123 = vmatpush3.bf16.msra.mxu0 %v1265_v26 }
  0x4b   : > { %1145 = vmatpush3.bf16.msra.mxu1 %v1266_v27  ;;  %1124 = vmatprep.subr.bf16.mxu0 %v1267_v28 }
  0x4c   : > { %1146 = vmatprep.subr.bf16.mxu1 %v1268_v29 }
  0x4e   : > { %1125 = vmatpush3.bf16.msra.mxu0 %v1269_v30 }
  0x4f   : > { %1147 = vmatpush3.bf16.msra.mxu1 %v1270_v31  ;;  %1154 = vmatprep.subr.bf16.mxu0 %v1275_v38 }
  0x50   : > { %1176 = vmatprep.subr.bf16.mxu1 %v1276_v39 }
  0x51   : > { %808 = vmatmul.mubr.bf16.vlgmr.msra.gmra.mxu0 %v1034_v34 }
  0x52   : > { %848 = vmatmul.mubr.bf16.vlgmr.msra.gmra.mxu1 %v1036_v36  ;;  %1155 = vmatpush3.bf16.msra.mxu0 %v1277_v40 }
  0x53   : > { %1177 = vmatpush3.bf16.msra.mxu1 %v1278_v41  ;;  %1156 = vmatprep.subr.bf16.mxu0 %v1279_v42 }
  0x54   : > { %1178 = vmatprep.subr.bf16.mxu1 %v1280_v43  ;;  %887 = vmatprep.mubr.bf16.mxu0 %v1039_v8 }
  0x55   : > { %927 = vmatprep.mubr.bf16.mxu1 %v1041_v11 }
  0x56   : > { %1157 = vmatpush3.bf16.msra.mxu0 %v1281_v44 }
  0x57   : > { %1179 = vmatpush3.bf16.msra.mxu1 %v1282_v45  ;;  %1158 = vmatprep.subr.bf16.mxu0 %v1283_v46 }
  0x58   : > { %1180 = vmatprep.subr.bf16.mxu1 %v1284_v47 }
  0x5a   : > { %1159 = vmatpush3.bf16.msra.mxu0 %v1285_v48 }
  0x5b   : > { %1181 = vmatpush3.bf16.msra.mxu1 %v1286_v49  ;;  %1160 = vmatprep.subr.bf16.mxu0 %v1287_v50 }
  0x5c   : > { %1182 = vmatprep.subr.bf16.mxu1 %v1288_v51 }
  0x5e   : > { %1161 = vmatpush3.bf16.msra.mxu0 %v1289_v52 }
  0x5f   : > { %1183 = vmatpush3.bf16.msra.mxu1 %v1290_v53  ;;  %1162 = vmatprep.subr.bf16.mxu0 %v1291_v54 }
  0x60   : > { %1184 = vmatprep.subr.bf16.mxu1 %v1292_v55 }
  0x62   : > { %1163 = vmatpush3.bf16.msra.mxu0 %v1293_v56 }
  0x63   : > { %1185 = vmatpush3.bf16.msra.mxu1 %v1294_v57  ;;  %1164 = vmatprep.subr.bf16.mxu0 %v1295_v58 }
  0x64   : > { %1186 = vmatprep.subr.bf16.mxu1 %v1296_v59 }
  0x66   : > { %1165 = vmatpush3.bf16.msra.mxu0 %v1297_v60 }
  0x67   : > { %1187 = vmatpush3.bf16.msra.mxu1 %v1298_v61  ;;  %1166 = vmatprep.subr.bf16.mxu0 %v1299_v62 }
  0x68   : > { %1188 = vmatprep.subr.bf16.mxu1 %v1300_v63 }
  0x6a   : > { %1167 = vmatpush3.bf16.msra.mxu0 %v1301_v0 }
  0x6b   : > { %1189 = vmatpush3.bf16.msra.mxu1 %v1302_v1  ;;  %1168 = vmatprep.subr.bf16.mxu0 %v1303_v2 }
  0x6c   : > { %1190 = vmatprep.subr.bf16.mxu1 %v1304_v3 }
  0x6e   : > { %1169 = vmatpush3.bf16.msra.mxu0 %v1305_v4 }
  0x6f   : > { %1191 = vmatpush3.bf16.msra.mxu1 %v1306_v5 }
  0x71   : > { %888 = vmatmul.mubr.bf16.vlgmr.msra.gmra.mxu0 %v1038_v7 }
  0x72   : > { %928 = vmatmul.mubr.bf16.vlgmr.msra.gmra.mxu1 %v1040_v10 }
 0x111   : > { %v1126_v12 = vpop.f32.mrf.mxu0 }
 0x112   : > { %v1148_v13 = vpop.f32.mrf.mxu1 }
 0x113   : > { %v1127_v14 = vpop.f32.mrf.mxu0 }
 0x114   : > { %v1149_v15 = vpop.f32.mrf.mxu1  ;;  %v1128_v20 = vadd.f32 %v1127_v14, %v1126_v12 }
 0x115   : > { %v1129_v16 = vpop.f32.mrf.mxu0  ;;  %v1150_v23 = vadd.f32 %v1149_v15, %v1148_v13 }
 0x116   : > { %v1151_v17 = vpop.f32.mrf.mxu1  ;;  %v810_v22 = vadd.f32 %v1128_v20, %v1033_v21 }
 0x117   : > { %v1130_v18 = vpop.f32.mrf.mxu0 }
 0x118   : > { %v1152_v19 = vpop.f32.mrf.mxu1  ;;  %v850_v28 = vadd.f32 %v1150_v23, %v810_v22 }
 0x131   : > { %v1170_v24 = vpop.f32.mrf.mxu0 }
 0x132   : > { %v1192_v25 = vpop.f32.mrf.mxu1 }
 0x133   : > { %v1171_v26 = vpop.f32.mrf.mxu0 }
 0x134   : > { %v1193_v27 = vpop.f32.mrf.mxu1  ;;  %v1172_v29 = vadd.f32 %v1171_v26, %v1170_v24 }
 0x135   : > { %v1173_v30 = vpop.f32.mrf.mxu0  ;;  %v1194_v33 = vadd.f32 %v1193_v27, %v1192_v25 }
 0x136   : > { %v1195_v31 = vpop.f32.mrf.mxu1  ;;  %v890_v32 = vadd.f32 %v1172_v29, %v850_v28 }
 0x137   : > { %v1174_v34 = vpop.f32.mrf.mxu0 }
 0x138   : > { %v1196_v35 = vpop.f32.mrf.mxu1  ;;  %v930_v36 = vadd.f32 %v1194_v33, %v890_v32 }
 0x13a   : > { %935 = vst [vmem:[%s222_s9] sm:$0xff] %v930_v36 }
 0x13b PF: > { %p13_p9 = scmp.ge.s32.totalorder %s1420_s17, 4   ;;  %s1591_s12 = smov %s1365_s13 }
 0x13c   : > { %s1592_s13 = smov %s1369_s14  ;;  %s1593_s14 = smov %s1430_s20 }
 0x13d   : > { %s1594_s15 = smov %s1420_s17  ;;  %15 = sbr.rel (!%p13_p9) target bundleno = 3 (0x3), region = 78 }
 0x142   :  { %955 = vsyncpa [#allocation3], 1 }
 0x143   :  { %957 = vsyncpa [#allocation3 + $0x1], 1 }

</bundles_post_ra>
